<compile_context>
chip_gen: v5e
topology: v5e:2x2
jax: 0.10.0
libtpu: 0.0.40
codegen_flags: <defaults>
</compile_context>

<pallas_src>
import math
import jax
import jax.numpy as jnp
from jax.experimental import pallas as pl
from jax.experimental.pallas import tpu as pltpu


# ---- packed-parameter slab layout: one (80, 128) f32 array ------------------
# Every weight operand starts at lane 0 and an 8-aligned sublane offset.
# rows  0:20, cols 0:6   -> W1 (20, 6)    (PyTorch nn.Linear layout: (out, in))
# rows  0:20, col  6     -> b1 (20,)
# rows 24:44, cols 0:20  -> W2 (20, 20)
# rows 24:44, col  20    -> b2 (20,)
# rows 48:68, cols 0:20  -> W3 (20, 20)
# rows 48:68, col  20    -> b3 (20,)
# rows 72:74, cols 0:20  -> W4 (2, 20)
# rows 72:74, col  20    -> b4 (2,)
SLAB_SHAPE = (80, 128)


def mlp_kernel(x_ref, w_ref, o_ref):
    # x_ref: (6, TB) feature-major batch tile -- batch on the 128-lane axis,
    # so every matmul below is a plain (out, k) @ (k, TB) with K on sublanes
    # of the rhs and on lanes of the lhs: no transposes anywhere.
    x = x_ref[...]                                              # (6, TB) f32

    h = jnp.dot(w_ref[0:20, 0:6], x,
                preferred_element_type=jnp.float32)             # (20, TB)
    h = jnp.maximum(h + w_ref[0:20, 6:7], 0.0)

    h = jnp.dot(w_ref[24:44, 0:20], h,
                preferred_element_type=jnp.float32)
    h = jnp.maximum(h + w_ref[24:44, 20:21], 0.0)               # (20, TB)

    h = jnp.dot(w_ref[48:68, 0:20], h,
                preferred_element_type=jnp.float32)
    h = jnp.maximum(h + w_ref[48:68, 20:21], 0.0)               # (20, TB)

    out = jnp.dot(w_ref[72:74, 0:20], h,
                  preferred_element_type=jnp.float32)
    o_ref[...] = (out + w_ref[72:74, 20:21]).astype(o_ref.dtype)  # (2, TB)


def pack_params(params):
    """Pack PyTorch-layout weights/biases into one VMEM-resident f32 slab."""
    slab = jnp.zeros(SLAB_SHAPE, jnp.float32)
    slab = slab.at[0:20, 0:6].set(params["w1"])
    slab = slab.at[0:20, 6].set(params["b1"])
    slab = slab.at[24:44, 0:20].set(params["w2"])
    slab = slab.at[24:44, 20].set(params["b2"])
    slab = slab.at[48:68, 0:20].set(params["w3"])
    slab = slab.at[48:68, 20].set(params["b3"])
    slab = slab.at[72:74, 0:20].set(params["w4"])
    slab = slab.at[72:74, 20].set(params["b4"])
    return slab


def _round_up(x, m):
    return ((x + m - 1) // m) * m


def _cdiv(a, b):
    return (a + b - 1) // b


def _pick_tile(B, block_batch):
    """Lane-dense batch tile (multiple of 128); keep >= 2 grid steps once
    B > 128 so the 'parallel' batch axis can shard across v7x's 2 TCs."""
    tb_cap = max(128, _round_up(block_batch, 128))
    if B <= 128:
        tb = 128
    else:
        tb = min(tb_cap, _round_up(_cdiv(B, 2), 128))
    b_pad = _round_up(B, tb)
    return tb, b_pad


def net_forward_feature_major(x_t, slab, *, block_batch=4096):
    """x_t: (6, B) f32 feature-major input, slab: pack_params(params).
    Returns (2, B) f32 (lane-dense; no output transpose)."""
    B = x_t.shape[1]
    tb, b_pad = _pick_tile(B, block_batch)
    if b_pad != B:
        x_t = jnp.pad(x_t, ((0, 0), (0, b_pad - B)))
    grid = (b_pad // tb,)

    out_t = pl.pallas_call(
        mlp_kernel,
        out_shape=jax.ShapeDtypeStruct((2, b_pad), jnp.float32),
        grid=grid,
        in_specs=[
            pl.BlockSpec((6, tb), lambda i: (0, i)),        # lane-dense x tiles
            pl.BlockSpec(SLAB_SHAPE, lambda i: (0, 0)),     # resident weights
        ],
        out_specs=pl.BlockSpec((2, tb), lambda i: (0, i)),  # lane-dense output
        compiler_params=pltpu.CompilerParams(
            dimension_semantics=("parallel",)),             # megacore on v7x
    )(x_t, slab)
    return out_t[:, :B]


def net_forward(x, slab, *, block_batch=4096):
    """PyTorch-parity wrapper. x: (B, 6) f32, returns (B, 2) f32.
    Consumers that can take feature-major data should call
    net_forward_feature_major directly and skip both boundary transposes."""
    return net_forward_feature_major(x.T, slab, block_batch=block_batch).T


def init_params(key):
    """PyTorch default Linear init (uniform +/- 1/sqrt(fan_in)), PyTorch
    weight layout (out_features, in_features)."""
    dims = [(6, 20), (20, 20), (20, 20), (20, 2)]
    params = {}
    for i, (fan_in, fan_out) in enumerate(dims, start=1):
        key, kw, kb = jax.random.split(key, 3)
        bound = 1.0 / math.sqrt(fan_in)
        params[f"w{i}"] = jax.random.uniform(
            kw, (fan_out, fan_in), jnp.float32, minval=-bound, maxval=bound)
        params[f"b{i}"] = jax.random.uniform(
            kb, (fan_out,), jnp.float32, minval=-bound, maxval=bound)
    return params


def reference_forward(x, params):
    hp = jax.lax.Precision.HIGHEST
    h = x
    for i in range(1, 5):
        h = jnp.dot(h, params[f"w{i}"].T, precision=hp) + params[f"b{i}"]
        if i < 4:
            h = jnp.maximum(h, 0.0)
    return h


if __name__ == "__main__":
    key = jax.random.PRNGKey(0)
    key, kx = jax.random.split(key)
    params = init_params(key)
    slab = pack_params(params)

    # Small demo batch (single 128-wide tile, padded batch).
    B = 8
    x = jax.random.normal(kx, (B, 6), jnp.float32)
    out = jax.block_until_ready(net_forward(x, slab))
    ref = reference_forward(x, params)
    assert out.shape == (B, 2)
    assert jnp.allclose(out, ref, atol=1e-4, rtol=1e-4), "mismatch vs reference"

    # Multi-tile path (grid = 2, non-128-aligned batch) + feature-major API.
    B2 = 300
    x2 = jax.random.normal(jax.random.PRNGKey(1), (B2, 6), jnp.float32)
    out2 = jax.block_until_ready(net_forward(x2, slab))
    ref2 = reference_forward(x2, params)
    assert out2.shape == (B2, 2)
    assert jnp.allclose(out2, ref2, atol=1e-4, rtol=1e-4), "tiled mismatch"

    out2_t = jax.block_until_ready(net_forward_feature_major(x2.T, slab))
    assert out2_t.shape == (2, B2)
    assert jnp.allclose(out2_t.T, ref2, atol=1e-4, rtol=1e-4), "fm mismatch"

    print("KERNEL_OK")
</pallas_src>

<mosaic_0001>
module attributes {stable_mosaic.version = 11 : i64} {
  func.func @mlp_kernel(%arg0: i32, %arg1: memref<6x128xf32, #tpu.memory_space<vmem>>, %arg2: memref<80x128xf32, #tpu.memory_space<vmem>>, %arg3: memref<2x128xf32, #tpu.memory_space<vmem>>) attributes {dimension_semantics = [#tpu.dimension_semantics<parallel>], iteration_bounds = array<i64: 1>, scalar_prefetch = 0 : i64, scratch_operands = 0 : i64, tpu.core_type = #tpu.core_type<tc>, window_params = [{transform_indices = @transform_0, window_bounds = array<i64: 6, 128>}, {pipeline_mode = #tpu.pipeline_mode<synchronous>, transform_indices = @transform_1, window_bounds = array<i64: 80, 128>}, {transform_indices = @transform_2, window_bounds = array<i64: 2, 128>}]} {
    %c0 = arith.constant 0 : index
    %c0_0 = arith.constant 0 : index
    %0 = vector.load %arg1[%c0, %c0_0] : memref<6x128xf32, #tpu.memory_space<vmem>>, vector<6x128xf32>
    %c0_1 = arith.constant 0 : index
    %c0_2 = arith.constant 0 : index
    %1 = vector.load %arg2[%c0_1, %c0_2] : memref<80x128xf32, #tpu.memory_space<vmem>>, vector<20x6xf32>
    %cst = arith.constant dense<0.000000e+00> : vector<20x128xf32>
    %2 = tpu.matmul %1, %0, %cst {dimension_numbers = #tpu.dot_dimension_numbers<[1], [0], [0], [1], [0, 0, 1, 1], [], []>} : vector<20x6xf32>, vector<6x128xf32>, vector<20x128xf32> -> vector<20x128xf32>
    %c0_3 = arith.constant 0 : index
    %c6 = arith.constant 6 : index
    %3 = vector.load %arg2[%c0_3, %c6] : memref<80x128xf32, #tpu.memory_space<vmem>>, vector<20x1xf32>
    %4 = vector.broadcast %3 : vector<20x1xf32> to vector<20x128xf32>
    %5 = arith.addf %2, %4 : vector<20x128xf32>
    %cst_4 = arith.constant 0.000000e+00 : f32
    %6 = vector.broadcast %cst_4 : f32 to vector<20x128xf32>
    %7 = arith.maximumf %5, %6 : vector<20x128xf32>
    %c24 = arith.constant 24 : index
    %c0_5 = arith.constant 0 : index
    %8 = vector.load %arg2[%c24, %c0_5] : memref<80x128xf32, #tpu.memory_space<vmem>>, vector<20x20xf32>
    %cst_6 = arith.constant dense<0.000000e+00> : vector<20x128xf32>
    %9 = tpu.matmul %8, %7, %cst_6 {dimension_numbers = #tpu.dot_dimension_numbers<[1], [0], [0], [1], [0, 0, 1, 1], [], []>} : vector<20x20xf32>, vector<20x128xf32>, vector<20x128xf32> -> vector<20x128xf32>
    %c24_7 = arith.constant 24 : index
    %c20 = arith.constant 20 : index
    %10 = vector.load %arg2[%c24_7, %c20] : memref<80x128xf32, #tpu.memory_space<vmem>>, vector<20x1xf32>
    %11 = vector.broadcast %10 : vector<20x1xf32> to vector<20x128xf32>
    %12 = arith.addf %9, %11 : vector<20x128xf32>
    %cst_8 = arith.constant 0.000000e+00 : f32
    %13 = vector.broadcast %cst_8 : f32 to vector<20x128xf32>
    %14 = arith.maximumf %12, %13 : vector<20x128xf32>
    %c48 = arith.constant 48 : index
    %c0_9 = arith.constant 0 : index
    %15 = vector.load %arg2[%c48, %c0_9] : memref<80x128xf32, #tpu.memory_space<vmem>>, vector<20x20xf32>
    %cst_10 = arith.constant dense<0.000000e+00> : vector<20x128xf32>
    %16 = tpu.matmul %15, %14, %cst_10 {dimension_numbers = #tpu.dot_dimension_numbers<[1], [0], [0], [1], [0, 0, 1, 1], [], []>} : vector<20x20xf32>, vector<20x128xf32>, vector<20x128xf32> -> vector<20x128xf32>
    %c48_11 = arith.constant 48 : index
    %c20_12 = arith.constant 20 : index
    %17 = vector.load %arg2[%c48_11, %c20_12] : memref<80x128xf32, #tpu.memory_space<vmem>>, vector<20x1xf32>
    %18 = vector.broadcast %17 : vector<20x1xf32> to vector<20x128xf32>
    %19 = arith.addf %16, %18 : vector<20x128xf32>
    %cst_13 = arith.constant 0.000000e+00 : f32
    %20 = vector.broadcast %cst_13 : f32 to vector<20x128xf32>
    %21 = arith.maximumf %19, %20 : vector<20x128xf32>
    %c72 = arith.constant 72 : index
    %c0_14 = arith.constant 0 : index
    %22 = vector.load %arg2[%c72, %c0_14] : memref<80x128xf32, #tpu.memory_space<vmem>>, vector<2x20xf32>
    %cst_15 = arith.constant dense<0.000000e+00> : vector<2x128xf32>
    %23 = tpu.matmul %22, %21, %cst_15 {dimension_numbers = #tpu.dot_dimension_numbers<[1], [0], [0], [1], [0, 0, 1, 1], [], []>} : vector<2x20xf32>, vector<20x128xf32>, vector<2x128xf32> -> vector<2x128xf32>
    %c72_16 = arith.constant 72 : index
    %c20_17 = arith.constant 20 : index
    %24 = vector.load %arg2[%c72_16, %c20_17] : memref<80x128xf32, #tpu.memory_space<vmem>>, vector<2x1xf32>
    %25 = vector.broadcast %24 : vector<2x1xf32> to vector<2x128xf32>
    %26 = arith.addf %23, %25 : vector<2x128xf32>
    %c0_18 = arith.constant 0 : index
    %c0_19 = arith.constant 0 : index
    %27 = vector.load %arg3[%c0_18, %c0_19] : memref<2x128xf32, #tpu.memory_space<vmem>>, vector<2x128xf32>
    tpu.vector_store %arg3[%c0_18, %c0_19], %26 {strides = array<i32>} : memref<2x128xf32, #tpu.memory_space<vmem>>, vector<2x128xf32>,
    return
  }
  func.func @transform_0(%arg0: i32) -> (i32, i32) {
    %c0_i32 = arith.constant 0 : i32
    %c0_i32_0 = arith.constant 0 : i32
    return %c0_i32, %arg0 : i32, i32
  }
  func.func @transform_1(%arg0: i32) -> (i32, i32) {
    %c0_i32 = arith.constant 0 : i32
    %c0_i32_0 = arith.constant 0 : i32
    %c0_i32_1 = arith.constant 0 : i32
    return %c0_i32, %c0_i32_0 : i32, i32
  }
  func.func @transform_2(%arg0: i32) -> (i32, i32) {
    %c0_i32 = arith.constant 0 : i32
    %c0_i32_0 = arith.constant 0 : i32
    return %c0_i32, %arg0 : i32, i32
  }
}

</mosaic_0001>

<bundles_post_ra>
// kernel: tpu_custom_call.1
= control target key start
LH: loop header
LB: loop body
LE: loop exit
PB: predicated region body
PF: predicated region fallthrough
CT: control target
= control target key end

     0   :  { %7 = vsyncpa [#allocation3], 0  ;;  %s410_s0 = inlined_call_operand.hbm [shape: f32[6,128], index: 0, kind: input, shape index: {}]   ;;  %s411_s1 = inlined_call_operand.hbm [shape: f32[80,128], index: 1, kind: input, shape index: {}]   ;;  %s412_s2 = inlined_call_operand.hbm [shape: f32[2,128], index: 2, kind: output, shape index: {}]  }
   0x1   :  { %8 = vsyncpa [#allocation6], 0 }
   0x2   :  { %9 = vsyncpa [#allocation4], 0  ;;  %s15_s11 = sshll.u32 %s410_s0, 4  ;;  %s369_s12 = smov [#allocation2]   ;;  %s16_s11 = int_to_ptr.hbm [resolvable:$true] %s15_s11 }
   0x3   :  { %s17_s13 = sshll.u32 %s369_s12, 4  ;;  %s25_s16 = sshll.u32 %s411_s1, 4  ;;  %s18_s13 = int_to_ptr.vmem [resolvable:$true] %s17_s13  ;;  %s26_s16 = int_to_ptr.hbm [resolvable:$true] %s25_s16 }
   0x4   :  { %20 = dma.hbm_to_vmem [thread:$0]  %s16_s11, 128, %s18_s13, [#allocation3]  }
   0x5   :  { %s370_s17 = smov [#allocation5]   ;;  %s371_s19 = smov 128  }
   0x6   :  { %s27_s18 = sshll.u32 %s370_s17, 4  ;;  %s372_s20 = smov 8   ;;  %s28_s18 = int_to_ptr.vmem [resolvable:$true] %s27_s18 }
   0x7   :  { %33 = dma.hbm_to_vmem [thread:$0]  %s26_s16, 1280, %s28_s18, [#allocation6], %s371_s19, %s371_s19, %s372_s20  }
   0x8   :  { %363 = dma.done.wait [#allocation3], 128  }
   0x9   :  { %364 = vsyncadd [#allocation3], 4294967168 }
   0xa   :  { %365 = dma.done.wait [#allocation6], 1280  }
   0xb   :  { %366 = vsyncadd [#allocation6], 4294966016  ;;  %v373_v0 = vmov 6   ;;  %vm68_vm0 = vcmask 1045504   ;;  %vm61_vm1 = vcmask 48128   ;;  %v43_v2 = vld [vmem:[#allocation5] sm:$0xff] }
   0xc   :  { %287 = vset.pattern.permute.xlu1 %v373_v0  ;;  %286 = vset.pattern.permute.xlu0 %v373_v0  ;;  %v42_v1 = vld [vmem:[#allocation2] sm:$0x3f]  ;;  %v45_v3 = vld [vmem:[#allocation5 + $0x10] sm:$0xf]  ;;  %v44_v4 = vld [vmem:[#allocation5 + $0x8] sm:$0xff]  ;;  %v374_v8 = vmov 20  }
   0xd   :  { %265 = vmatpush.msk.msra.mxu0 %vm68_vm0, %v42_v1  ;;  %48 = vperm.xlu1 %287, %v43_v2   ;;  %v103_v6 = vld [vmem:[#allocation5 + $0x28] sm:$0xf]  ;;  %v102_v7 = vld [vmem:[#allocation5 + $0x20] sm:$0xff]  ;;  %v160_v11 = vld [vmem:[#allocation5 + $0x38] sm:$0xff]  ;;  %vm126_vm2 = vcmask 1043456   ;;  %vm119_vm3 = vcmask 162816  }
   0xe   :  { %266 = vmatmul.msk.f32.vlgmr.msra.gmra.mxu0 %vm61_vm1, %v43_v2  ;;  %58 = vperm.xlu0 %286, %v45_v3   ;;  %v101_v12 = vld [vmem:[#allocation5 + $0x18] sm:$0xff]  ;;  %v215_v18 = vld [vmem:[#allocation5 + $0x48] sm:$0x3]  ;;  %v159_v19 = vld [vmem:[#allocation5 + $0x30] sm:$0xff]  ;;  %s375_s0 = smov [#allocation7]   ;;  %s254_s23 = sshll.u32 %s412_s2, 4  ;;  %s255_s23 = int_to_ptr.hbm [resolvable:$true] %s254_s23 }
   0xf   :  { %289 = vset.pattern.permute.xlu2 %v374_v8  ;;  %v161_v25 = vld [vmem:[#allocation5 + $0x40] sm:$0xf]  ;;  %s252_s1 = sshll.u32 %s375_s0, 4  ;;  %s253_s1 = int_to_ptr.vmem [resolvable:$true] %s252_s1 }
  0x10   :  { %111 = vperm.xlu2 %289, %v102_v7  }
  0x15   :  { %288 = vset.pattern.permute.xlu1 %v374_v8 }
  0x16   :  { %267 = vmatmul.msk.f32.gmra.mxu0 %vm61_vm1, %v44_v4  ;;  %53 = vperm.xlu0 %286, %v44_v4  }
  0x17   :  { %116 = vperm.xlu1 %288, %v103_v6  }
  0x18   :  { %106 = vperm.xlu2 %289, %v101_v12  }
  0x1e   :  { %268 = vmatmul.msk.f32.gmra.mxu0 %vm61_vm1, %v45_v3  ;;  %290 = vset.pattern.permute.xlu0 %v374_v8 }
  0x1f   :  { %169 = vperm.xlu1 %288, %v160_v11   ;;  %174 = vperm.xlu0 %290, %v161_v25  }
  0x20   :  { %164 = vperm.xlu2 %289, %v159_v19  }
  0x27   :  { %218 = vperm.xlu1 %288, %v215_v18  }
  0x6a   :  { %v112_v26 = vpop.permute.xlu2 %111 }
  0x72   :  { %v107_v28 = vpop.permute.xlu2 %106 }
  0x7a   :  { %v165_v44 = vpop.permute.xlu2 %164 }
  0x7f   :  { %v49_v14 = vpop.permute.xlu1 %48 }
  0x80   :  { %v59_v9 = vpop.permute.xlu0 %58 }
  0x88   :  { %v54_v13 = vpop.permute.xlu0 %53 }
  0x89   :  { %v117_v29 = vpop.permute.xlu1 %116 }
  0x8b   :  { %v89_v5 = vpop.f32.mrf.mxu0 }
  0x8c   :  { %v90_v20 = vadd.f32 %v89_v5, %v49_v14 }
  0x8e   :  { %v98_v23 = vmax.f32 %v90_v20, 0.0 }
  0x91   :  { %v175_v39 = vpop.permute.xlu0 %174  ;;  %v170_v40 = vpop.permute.xlu1 %169 }
  0x93   :  { %v92_v10 = vpop.f32.mrf.mxu0 }
  0x94   :  { %v93_v16 = vadd.f32 %v92_v10, %v54_v13 }
  0x96   :  { %v99_v22 = vmax.f32 %v93_v16, 0.0 }
  0x99   :  { %v219_v49 = vpop.permute.xlu1 %218 }
  0x9b   :  { %v95_v15 = vpop.f32.mrf.mxu0 }
  0x9c   :  { %v96_v17 = vadd.f32 %v95_v15, %v59_v9 }
  0x9e   :  { %v100_v21 = vmax.f32 %v96_v17, 0.0 }
  0xa0   :  { %269 = vmatpush.msk.msra.mxu1 %vm126_vm2, %v100_v21 }
  0xa2   :  { %144 = vmatpush.msra.mxu1 %v99_v22 }
  0xa4   :  { %145 = vmatpush.msra.mxu1 %v98_v23 }
  0xa5   :  { %270 = vmatmul.msk.f32.vlgmr.msra.gmra.mxu1 %vm119_vm3, %v101_v12 }
  0xad   :  { %271 = vmatmul.msk.f32.gmra.mxu1 %vm119_vm3, %v102_v7 }
  0xb5   :  { %272 = vmatmul.msk.f32.gmra.mxu1 %vm119_vm3, %v103_v6 }
 0x122   :  { %v147_v24 = vpop.f32.mrf.mxu1 }
 0x123   :  { %v148_v33 = vadd.f32 %v147_v24, %v107_v28 }
 0x125   :  { %v156_v36 = vmax.f32 %v148_v33, 0.0 }
 0x12a   :  { %v150_v27 = vpop.f32.mrf.mxu1 }
 0x12b   :  { %v151_v31 = vadd.f32 %v150_v27, %v112_v26 }
 0x12d   :  { %v157_v35 = vmax.f32 %v151_v31, 0.0 }
 0x132   :  { %v153_v30 = vpop.f32.mrf.mxu1 }
 0x133   :  { %v154_v32 = vadd.f32 %v153_v30, %v117_v29 }
 0x135   :  { %v158_v34 = vmax.f32 %v154_v32, 0.0 }
 0x137   :  { %273 = vmatpush.msk.msra.mxu2 %vm126_vm2, %v158_v34 }
 0x139   :  { %200 = vmatpush.msra.mxu2 %v157_v35 }
 0x13b   :  { %201 = vmatpush.msra.mxu2 %v156_v36 }
 0x13c   :  { %274 = vmatmul.msk.f32.vlgmr.msra.gmra.mxu2 %vm119_vm3, %v159_v19 }
 0x144   :  { %275 = vmatmul.msk.f32.gmra.mxu2 %vm119_vm3, %v160_v11 }
 0x14c   :  { %276 = vmatmul.msk.f32.gmra.mxu2 %vm119_vm3, %v161_v25 }
 0x1bf   :  { %v203_v37 = vpop.f32.mrf.mxu2 }
 0x1c0   :  { %v204_v45 = vadd.f32 %v203_v37, %v165_v44 }
 0x1c2   :  { %v212_v48 = vmax.f32 %v204_v45, 0.0 }
 0x1c7   :  { %v206_v38 = vpop.f32.mrf.mxu2 }
 0x1c8   :  { %v207_v42 = vadd.f32 %v206_v38, %v170_v40 }
 0x1ca   :  { %v213_v47 = vmax.f32 %v207_v42, 0.0 }
 0x1cf   :  { %v209_v41 = vpop.f32.mrf.mxu2 }
 0x1d0   :  { %v210_v43 = vadd.f32 %v209_v41, %v175_v39 }
 0x1d2   :  { %v214_v46 = vmax.f32 %v210_v43, 0.0 }
 0x1d4   :  { %277 = vmatpush.msk.msra.mxu3 %vm126_vm2, %v214_v46 }
 0x1d6   :  { %240 = vmatpush.msra.mxu3 %v213_v47 }
 0x1d8   :  { %241 = vmatpush.msra.mxu3 %v212_v48 }
 0x1d9   :  { %278 = vmatmul.msk.f32.vlgmr.msra.gmra.mxu3 %vm119_vm3, %v215_v18 }
 0x25c   :  { %v243_v50 = vpop.f32.mrf.mxu3 }
 0x25d   :  { %v244_v51 = vadd.f32 %v243_v50, %v219_v49 }
 0x25f   :  { %246 = vst [vmem:[#allocation7] sm:$0x3] %v244_v51 }
 0x260   :  { %257 = dma.vmem_to_hbm [thread:$0]  %s253_s1, 32, %s255_s23, [#allocation4]  }
 0x261   :  { %367 = dma.done.wait [#allocation4], 32  }
 0x262   :  { %368 = vsyncadd [#allocation4], 4294967264 }
 0x263   :  { %262 = vsyncpa [#allocation3], 1 }
 0x264   :  { %263 = vsyncpa [#allocation6], 1 }
 0x265   :  { %264 = vsyncpa [#allocation4], 1 }

</bundles_post_ra>
